<compile_context>
chip_gen: v6e
topology: v6e:2x2x1
jax: 0.10.0
libtpu: 0.0.40
codegen_flags: <defaults>
</compile_context>

<pallas_src>
import jax
import jax.numpy as jnp
from jax.experimental import pallas as pl
from jax.experimental.pallas import tpu as pltpu


def mlp_kernel(x_ref, w1_ref, b1_ref, w2_ref, b2_ref, w3_ref, b3_ref, o_ref):
    # fc1 + ReLU: cast x to bf16 in-kernel (no wrapper-side materialization),
    # bf16 MXU operands, f32 accumulate, f32 epilogue.  K=784 contraction is
    # handled by Mosaic (padding lanes of the contracting dim are masked).
    x = x_ref[...].astype(w1_ref.dtype)
    h1 = jnp.dot(x, w1_ref[...], preferred_element_type=jnp.float32)
    h1 = jnp.maximum(h1 + b1_ref[...], 0.0)
    # fc2 + ReLU
    h2 = jnp.dot(h1.astype(w2_ref.dtype), w2_ref[...],
                 preferred_element_type=jnp.float32)
    h2 = jnp.maximum(h2 + b2_ref[...], 0.0)
    # fc3 (no activation).  Output lanes padded to 128 -> unmasked full stores.
    h3 = jnp.dot(h2.astype(w3_ref.dtype), w3_ref[...],
                 preferred_element_type=jnp.float32)
    o_ref[...] = (h3 + b3_ref[...]).astype(o_ref.dtype)


def fully_connected_forward(x, w1, b1, w2, b2, w3, b3,
                            *, tb=256, compute_dtype=jnp.bfloat16):
    """x: [B, 784] float32. Returns logits [B, 10] float32."""
    B, K = x.shape
    N1 = w1.shape[1]          # 256
    N2 = w2.shape[1]          # 128
    N3 = w3.shape[1]          # 10
    N3_pad = 128              # lane-dense output width

    # Weights cast once to bf16 (tiny vs. x traffic); w3/b3 zero-padded to a
    # lane-dense 128 output width (zero columns -> zero logits, sliced off).
    w1_c = w1.astype(compute_dtype)
    w2_c = w2.astype(compute_dtype)
    w3_p = jnp.zeros((N2, N3_pad), compute_dtype).at[:, :N3].set(
        w3.astype(compute_dtype))

    # Biases kept 2-D ([1, out]) and f32 (epilogue runs in f32).
    b1_2d = b1.reshape(1, -1).astype(jnp.float32)
    b2_2d = b2.reshape(1, -1).astype(jnp.float32)
    b3_2d = jnp.zeros((1, N3_pad), jnp.float32).at[:, :N3].set(
        b3.astype(jnp.float32))

    # Batch tiling.  Small-batch path: one grid step whose block is the full
    # batch (block dim == array dim is always legal), so x is passed through
    # untouched -- no pad, no cast, no extra HBM round trip.
    if B <= tb:
        tb_eff = B
        B_pad = B
        x_in = x
    else:
        tb_eff = tb
        B_pad = pl.cdiv(B, tb_eff) * tb_eff
        x_in = x if B_pad == B else jnp.pad(x, ((0, B_pad - B), (0, 0)))

    grid = (B_pad // tb_eff,)

    # Weights / biases: constant index_map -> fetched once, VMEM-resident.
    resident = lambda arr: pl.BlockSpec(arr.shape, lambda i: (0,) * arr.ndim)

    out_padded = pl.pallas_call(
        mlp_kernel,
        out_shape=jax.ShapeDtypeStruct((B_pad, N3_pad), jnp.float32),
        grid=grid,
        in_specs=[
            pl.BlockSpec((tb_eff, K), lambda i: (i, 0)),   # x: streamed by batch tile
            resident(w1_c), resident(b1_2d),
            resident(w2_c), resident(b2_2d),
            resident(w3_p), resident(b3_2d),
        ],
        out_specs=pl.BlockSpec((tb_eff, N3_pad), lambda i: (i, 0)),
        compiler_params=pltpu.CompilerParams(
            # "parallel" batch axis: with >= 2 grid steps both TCs are used on v7x.
            dimension_semantics=("parallel",),
            # Generous headroom (working set at tb=256 is ~4 MiB incl. spills
            # of the 256x256 f32 h1 intermediate, which is fine while HBM-bound).
            vmem_limit_bytes=32 << 20,
        ),
    )(x_in, w1_c, b1_2d, w2_c, b2_2d, w3_p, b3_2d)

    return out_padded[:B, :N3]


def init_params(key):
    """Deterministic parameter init matching nn.Linear shapes.

    PyTorch nn.Linear(in, out) has weight (out, in) and bias (out,), init
    U(-1/sqrt(in), 1/sqrt(in)). We store weights transposed as (in, out).
    """
    dims = [(784, 256), (256, 128), (128, 10)]
    params = []
    for (fan_in, fan_out) in dims:
        key, kw, kb = jax.random.split(key, 3)
        bound = 1.0 / jnp.sqrt(fan_in)
        w = jax.random.uniform(kw, (fan_in, fan_out), jnp.float32, -bound, bound)
        b = jax.random.uniform(kb, (fan_out,), jnp.float32, -bound, bound)
        params += [w, b]
    return params


def _reference_bf16(x, w1, b1, w2, b2, w3, b3):
    bf = jnp.bfloat16
    h = jnp.maximum(jnp.dot(x.astype(bf), w1.astype(bf),
                            preferred_element_type=jnp.float32) + b1, 0.0)
    h = jnp.maximum(jnp.dot(h.astype(bf), w2.astype(bf),
                            preferred_element_type=jnp.float32) + b2, 0.0)
    return jnp.dot(h.astype(bf), w3.astype(bf),
                   preferred_element_type=jnp.float32) + b3


def _reference_f32(x, w1, b1, w2, b2, w3, b3):
    h = jnp.maximum(x @ w1 + b1, 0.0)
    h = jnp.maximum(h @ w2 + b2, 0.0)
    return h @ w3 + b3


if __name__ == "__main__":
    key = jax.random.PRNGKey(0)
    key, kx1, kx2 = jax.random.split(key, 3)
    w1, b1, w2, b2, w3, b3 = init_params(key)

    # --- Small (inference-style) batch: single grid step, zero x padding. ---
    batch = 8
    x = jax.random.normal(kx1, (batch, 784), jnp.float32)
    out = fully_connected_forward(x, w1, b1, w2, b2, w3, b3)
    out = jax.block_until_ready(out)
    assert out.shape == (batch, 10)

    ref_bf16 = _reference_bf16(x, w1, b1, w2, b2, w3, b3)
    assert jnp.allclose(out, ref_bf16, atol=1e-2, rtol=1e-2)
    ref_f32 = _reference_f32(x, w1, b1, w2, b2, w3, b3)
    assert jnp.allclose(out, ref_f32, atol=5e-2, rtol=5e-2)

    # --- Multi-step grid path (exercises tiling + batch padding). ---
    batch2 = 384                       # tb=256 -> padded to 512, 2 grid steps
    x2 = jax.random.normal(kx2, (batch2, 784), jnp.float32)
    out2 = fully_connected_forward(x2, w1, b1, w2, b2, w3, b3)
    out2 = jax.block_until_ready(out2)
    assert out2.shape == (batch2, 10)

    ref2_bf16 = _reference_bf16(x2, w1, b1, w2, b2, w3, b3)
    assert jnp.allclose(out2, ref2_bf16, atol=1e-2, rtol=1e-2)
    ref2_f32 = _reference_f32(x2, w1, b1, w2, b2, w3, b3)
    assert jnp.allclose(out2, ref2_f32, atol=5e-2, rtol=5e-2)

    print("KERNEL_OK")
</pallas_src>

<mosaic_0001>
module attributes {stable_mosaic.version = 11 : i64} {
  func.func @mlp_kernel(%arg0: i32, %arg1: memref<8x784xf32, #tpu.memory_space<vmem>>, %arg2: memref<784x256xbf16, #tpu.memory_space<vmem>>, %arg3: memref<1x256xf32, #tpu.memory_space<vmem>>, %arg4: memref<256x128xbf16, #tpu.memory_space<vmem>>, %arg5: memref<1x128xf32, #tpu.memory_space<vmem>>, %arg6: memref<128x128xbf16, #tpu.memory_space<vmem>>, %arg7: memref<1x128xf32, #tpu.memory_space<vmem>>, %arg8: memref<8x128xf32, #tpu.memory_space<vmem>>) attributes {dimension_semantics = [#tpu.dimension_semantics<parallel>], iteration_bounds = array<i64: 1>, scalar_prefetch = 0 : i64, scratch_operands = 0 : i64, tpu.core_type = #tpu.core_type<tc>, window_params = [{transform_indices = @transform_0, window_bounds = array<i64: 8, 784>}, {pipeline_mode = #tpu.pipeline_mode<synchronous>, transform_indices = @transform_1, window_bounds = array<i64: 784, 256>}, {pipeline_mode = #tpu.pipeline_mode<synchronous>, transform_indices = @transform_2, window_bounds = array<i64: 1, 256>}, {pipeline_mode = #tpu.pipeline_mode<synchronous>, transform_indices = @transform_3, window_bounds = array<i64: 256, 128>}, {pipeline_mode = #tpu.pipeline_mode<synchronous>, transform_indices = @transform_4, window_bounds = array<i64: 1, 128>}, {pipeline_mode = #tpu.pipeline_mode<synchronous>, transform_indices = @transform_5, window_bounds = array<i64: 128, 128>}, {pipeline_mode = #tpu.pipeline_mode<synchronous>, transform_indices = @transform_6, window_bounds = array<i64: 1, 128>}, {transform_indices = @transform_7, window_bounds = array<i64: 8, 128>}]} {
    %c0 = arith.constant 0 : index
    %c0_0 = arith.constant 0 : index
    %0 = vector.load %arg1[%c0, %c0_0] : memref<8x784xf32, #tpu.memory_space<vmem>>, vector<8x784xf32>
    %1 = arith.truncf %0 : vector<8x784xf32> to vector<8x784xbf16>
    %c0_1 = arith.constant 0 : index
    %c0_2 = arith.constant 0 : index
    %2 = vector.load %arg2[%c0_1, %c0_2] : memref<784x256xbf16, #tpu.memory_space<vmem>>, vector<784x256xbf16>
    %cst = arith.constant dense<0.000000e+00> : vector<8x256xf32>
    %3 = tpu.matmul %1, %2, %cst {dimension_numbers = #tpu.dot_dimension_numbers<[1], [0], [0], [1], [0, 0, 1, 1], [], []>} : vector<8x784xbf16>, vector<784x256xbf16>, vector<8x256xf32> -> vector<8x256xf32>
    %c0_3 = arith.constant 0 : index
    %c0_4 = arith.constant 0 : index
    %4 = vector.load %arg3[%c0_3, %c0_4] : memref<1x256xf32, #tpu.memory_space<vmem>>, vector<1x256xf32>
    %5 = vector.broadcast %4 : vector<1x256xf32> to vector<8x256xf32>
    %6 = arith.addf %3, %5 : vector<8x256xf32>
    %cst_5 = arith.constant 0.000000e+00 : f32
    %7 = vector.broadcast %cst_5 : f32 to vector<8x256xf32>
    %8 = arith.maximumf %6, %7 : vector<8x256xf32>
    %9 = arith.truncf %8 : vector<8x256xf32> to vector<8x256xbf16>
    %c0_6 = arith.constant 0 : index
    %c0_7 = arith.constant 0 : index
    %10 = vector.load %arg4[%c0_6, %c0_7] : memref<256x128xbf16, #tpu.memory_space<vmem>>, vector<256x128xbf16>
    %cst_8 = arith.constant dense<0.000000e+00> : vector<8x128xf32>
    %11 = tpu.matmul %9, %10, %cst_8 {dimension_numbers = #tpu.dot_dimension_numbers<[1], [0], [0], [1], [0, 0, 1, 1], [], []>} : vector<8x256xbf16>, vector<256x128xbf16>, vector<8x128xf32> -> vector<8x128xf32>
    %c0_9 = arith.constant 0 : index
    %c0_10 = arith.constant 0 : index
    %12 = vector.load %arg5[%c0_9, %c0_10] : memref<1x128xf32, #tpu.memory_space<vmem>>, vector<1x128xf32>
    %13 = vector.broadcast %12 : vector<1x128xf32> to vector<8x128xf32>
    %14 = arith.addf %11, %13 : vector<8x128xf32>
    %cst_11 = arith.constant 0.000000e+00 : f32
    %15 = vector.broadcast %cst_11 : f32 to vector<8x128xf32>
    %16 = arith.maximumf %14, %15 : vector<8x128xf32>
    %17 = arith.truncf %16 : vector<8x128xf32> to vector<8x128xbf16>
    %c0_12 = arith.constant 0 : index
    %c0_13 = arith.constant 0 : index
    %18 = vector.load %arg6[%c0_12, %c0_13] : memref<128x128xbf16, #tpu.memory_space<vmem>>, vector<128x128xbf16>
    %cst_14 = arith.constant dense<0.000000e+00> : vector<8x128xf32>
    %19 = tpu.matmul %17, %18, %cst_14 {dimension_numbers = #tpu.dot_dimension_numbers<[1], [0], [0], [1], [0, 0, 1, 1], [], []>} : vector<8x128xbf16>, vector<128x128xbf16>, vector<8x128xf32> -> vector<8x128xf32>
    %c0_15 = arith.constant 0 : index
    %c0_16 = arith.constant 0 : index
    %20 = vector.load %arg7[%c0_15, %c0_16] : memref<1x128xf32, #tpu.memory_space<vmem>>, vector<1x128xf32>
    %21 = vector.broadcast %20 : vector<1x128xf32> to vector<8x128xf32>
    %22 = arith.addf %19, %21 : vector<8x128xf32>
    %c0_17 = arith.constant 0 : index
    %c0_18 = arith.constant 0 : index
    %23 = vector.load %arg8[%c0_17, %c0_18] : memref<8x128xf32, #tpu.memory_space<vmem>>, vector<8x128xf32>
    tpu.vector_store %arg8[%c0_17, %c0_18], %22 {strides = array<i32>} : memref<8x128xf32, #tpu.memory_space<vmem>>, vector<8x128xf32>,
    return
  }
  func.func @transform_0(%arg0: i32) -> (i32, i32) {
    %c0_i32 = arith.constant 0 : i32
    %c0_i32_0 = arith.constant 0 : i32
    return %arg0, %c0_i32 : i32, i32
  }
  func.func @transform_1(%arg0: i32) -> (i32, i32) {
    %c0_i32 = arith.constant 0 : i32
    %c0_i32_0 = arith.constant 0 : i32
    %c0_i32_1 = arith.constant 0 : i32
    return %c0_i32, %c0_i32_0 : i32, i32
  }
  func.func @transform_2(%arg0: i32) -> (i32, i32) {
    %c0_i32 = arith.constant 0 : i32
    %c0_i32_0 = arith.constant 0 : i32
    %c0_i32_1 = arith.constant 0 : i32
    return %c0_i32, %c0_i32_0 : i32, i32
  }
  func.func @transform_3(%arg0: i32) -> (i32, i32) {
    %c0_i32 = arith.constant 0 : i32
    %c0_i32_0 = arith.constant 0 : i32
    %c0_i32_1 = arith.constant 0 : i32
    return %c0_i32, %c0_i32_0 : i32, i32
  }
  func.func @transform_4(%arg0: i32) -> (i32, i32) {
    %c0_i32 = arith.constant 0 : i32
    %c0_i32_0 = arith.constant 0 : i32
    %c0_i32_1 = arith.constant 0 : i32
    return %c0_i32, %c0_i32_0 : i32, i32
  }
  func.func @transform_5(%arg0: i32) -> (i32, i32) {
    %c0_i32 = arith.constant 0 : i32
    %c0_i32_0 = arith.constant 0 : i32
    %c0_i32_1 = arith.constant 0 : i32
    return %c0_i32, %c0_i32_0 : i32, i32
  }
  func.func @transform_6(%arg0: i32) -> (i32, i32) {
    %c0_i32 = arith.constant 0 : i32
    %c0_i32_0 = arith.constant 0 : i32
    %c0_i32_1 = arith.constant 0 : i32
    return %c0_i32, %c0_i32_0 : i32, i32
  }
  func.func @transform_7(%arg0: i32) -> (i32, i32) {
    %c0_i32 = arith.constant 0 : i32
    %c0_i32_0 = arith.constant 0 : i32
    return %arg0, %c0_i32 : i32, i32
  }
}

</mosaic_0001>

<bundles_post_ra>
// kernel: tpu_custom_call.1
= control target key start
LH: loop header
LB: loop body
LE: loop exit
PB: predicated region body
PF: predicated region fallthrough
CT: control target
= control target key end

     0   :  { %12 = vsyncpa [#allocation3], 0  ;;  %s1726_s0 = inlined_call_operand.hbm [shape: f32[8,784], index: 0, kind: input, shape index: {}]   ;;  %s1727_s1 = inlined_call_operand.hbm [shape: bf16[784,256], index: 1, kind: input, shape index: {}]   ;;  %s1728_s2 = inlined_call_operand.vmem [shape: f32[1,256], index: 2, kind: input, shape index: {}]   ;;  %s1729_s3 = inlined_call_operand.hbm [shape: bf16[256,128], index: 3, kind: input, shape index: {}]   ;;  %s1730_s4 = inlined_call_operand.vmem [shape: f32[1,128], index: 4, kind: input, shape index: {}]   ;;  %s1731_s5 = inlined_call_operand.hbm [shape: bf16[128,128], index: 5, kind: input, shape index: {}]   ;;  %s1732_s6 = inlined_call_operand.vmem [shape: f32[1,128], index: 6, kind: input, shape index: {}]   ;;  %s1733_s7 = inlined_call_operand.hbm [shape: f32[8,128], index: 7, kind: output, shape index: {}]  }
   0x1   :  { %13 = vsyncpa [#allocation6], 0 }
   0x2   :  { %14 = vsyncpa [#allocation9], 0 }
   0x3   :  { %15 = vsyncpa [#allocation4], 0  ;;  %s1640_s24 = smov [#allocation5]  }
   0x4   :  { %s31_s25 = sshll.u32 %s1640_s24, 4  ;;  %s32_s25 = int_to_ptr.vmem [resolvable:$true] %s31_s25 }
   0x5   :  { %s1540_s26 = scalar_lea.vmem %s32_s25, 12544  ;;  %p1545_p1 = scmp.lt.s32.totalorder %s32_s25, %s32_s25 }
   0x6   :  { %p1541_p0 = scmp.ne.s32.totalorder %s32_s25, %s1540_s26  ;;  %p1546_p2 = scmp.lt.s32.totalorder %s1540_s26, %s1540_s26 }
   0x8   :  { %p1547_p3 = por %p1546_p2, %p1545_p1 }
   0xa   :  { %p1548_p4 = pnand %p1547_p3, %p1541_p0 }
   0xc   :  { %1551 = shalt.err (!%p1548_p4)
}
   0xd   :  { %s1641_s27 = smov 128   ;;  %s1642_s28 = smov 8  }
   0xe   :  { %37 = dma.hbm_to_vmem [thread:$0]  %s1727_s1, 12544, %s32_s25, [#allocation6], %s1641_s27, %s1641_s27, %s1642_s28  }
   0xf   :  { %s1643_s8 = smov [#allocation2]   ;;  %s1644_s10 = smov [#allocation7]  }
  0x10   :  { %s22_s9 = sshll.u32 %s1643_s8, 4  ;;  %s45_s11 = sshll.u32 %s1644_s10, 4  ;;  %s23_s9 = int_to_ptr.vmem [resolvable:$true] %s22_s9  ;;  %s46_s11 = int_to_ptr.vmem [resolvable:$true] %s45_s11 }
  0x11   :  { %s1560_s12 = scalar_lea.vmem %s23_s9, 896  ;;  %p1565_p6 = scmp.lt.s32.totalorder %s23_s9, %s23_s9 }
  0x12   :  { %p1561_p5 = scmp.ne.s32.totalorder %s23_s9, %s1560_s12  ;;  %p1566_p7 = scmp.lt.s32.totalorder %s1560_s12, %s1560_s12 }
  0x14   :  { %p1567_p8 = por %p1566_p7, %p1565_p6 }
  0x16   :  { %p1568_p9 = pnand %p1567_p8, %p1561_p5 }
  0x18   :  { %1571 = shalt.err (!%p1568_p9)
}
  0x19   :  { %25 = dma.hbm_to_vmem [thread:$0]  %s1726_s0, 896, %s23_s9, [#allocation3]  }
  0x1a   :  { %s1580_s15 = scalar_lea.vmem %s46_s11, 2048  ;;  %p1585_p11 = scmp.lt.s32.totalorder %s46_s11, %s46_s11 }
  0x1b   :  { %p1581_p10 = scmp.ne.s32.totalorder %s46_s11, %s1580_s15  ;;  %p1586_p12 = scmp.lt.s32.totalorder %s1580_s15, %s1580_s15 }
  0x1d   :  { %p1587_p13 = por %p1586_p12, %p1585_p11 }
  0x1f   :  { %p1588_p0 = pnand %p1587_p13, %p1581_p10 }
  0x21   :  { %1591 = shalt.err (!%p1588_p0)
}
  0x22   :  { %s1645_s1 = smov 64   ;;  %s1646_s16 = smov 4  }
  0x23   :  { %51 = dma.hbm_to_vmem [thread:$0]  %s1729_s3, 2048, %s46_s11, [#allocation6], %s1645_s1, %s1645_s1, %s1646_s16  }
  0x24   :  { %s1647_s19 = smov [#allocation8]  }
  0x25   :  { %s59_s20 = sshll.u32 %s1647_s19, 4  ;;  %s60_s20 = int_to_ptr.vmem [resolvable:$true] %s59_s20 }
  0x26   :  { %s1600_s21 = scalar_lea.vmem %s60_s20, 1024  ;;  %p1605_p2 = scmp.lt.s32.totalorder %s60_s20, %s60_s20 }
  0x27   :  { %p1601_p1 = scmp.ne.s32.totalorder %s60_s20, %s1600_s21  ;;  %p1606_p3 = scmp.lt.s32.totalorder %s1600_s21, %s1600_s21 }
  0x29   :  { %p1607_p4 = por %p1606_p3, %p1605_p2 }
  0x2b   :  { %p1608_p5 = pnand %p1607_p4, %p1601_p1 }
  0x2d   :  { %1611 = shalt.err (!%p1608_p5)
}
  0x2e   :  { %65 = dma.hbm_to_vmem [thread:$0]  %s1731_s5, 1024, %s60_s20, [#allocation9], %s1645_s1, %s1645_s1, %s1646_s16  }
  0x2f   :  { %1632 = dma.done.wait [#allocation3], 896  }
  0x30   :  { %1633 = vsyncadd [#allocation3], 4294966400 }
  0x31   :  { %1634 = dma.done.wait [#allocation6], 14592  }
  0x32   :  { %1635 = vsyncadd [#allocation6], 4294952704 }
  0x33   :  { %1636 = dma.done.wait [#allocation9], 1024  }
  0x34   :  { %1637 = vsyncadd [#allocation9], 4294966272  ;;  %v1361_v0 = vld [vmem:[#allocation5 + $0x74] ss:$8 sps:$4 sm:$0xff]   ;;  %v1363_v1 = vld [vmem:[#allocation5 + $0x70] ss:$8 sps:$4 sm:$0xff]  }
  0x35   :  { %699 = vmatprep.subr.bf16.mxu0 %v1361_v0  ;;  %v1364_v2 = vld [vmem:[#allocation5 + $0x174] ss:$8 sps:$4 sm:$0xff]   ;;  %v1366_v3 = vld [vmem:[#allocation5 + $0x170] ss:$8 sps:$4 sm:$0xff]   ;;  %v1367_v4 = vld [vmem:[#allocation5 + $0x64] ss:$8 sps:$4 sm:$0xff]  }
  0x36   :  { %700 = vmatpush1.bf16.msra.mxu0 %v1363_v1  ;;  %v1369_v5 = vld [vmem:[#allocation5 + $0x60] ss:$8 sps:$4 sm:$0xff]   ;;  %740 = vmatprep.subr.bf16.mxu1 %v1364_v2  ;;  %v1370_v6 = vld [vmem:[#allocation5 + $0x164] ss:$8 sps:$4 sm:$0xff]   ;;  %v1373_v8 = vld [vmem:[#allocation5 + $0x54] ss:$8 sps:$4 sm:$0xff]  }
  0x37   :  { %741 = vmatpush1.bf16.msra.mxu1 %v1366_v3  ;;  %701 = vmatprep.subr.bf16.mxu0 %v1367_v4  ;;  %v1372_v7 = vld [vmem:[#allocation5 + $0x160] ss:$8 sps:$4 sm:$0xff]   ;;  %v1375_v9 = vld [vmem:[#allocation5 + $0x50] ss:$8 sps:$4 sm:$0xff]   ;;  %v1376_v10 = vld [vmem:[#allocation5 + $0x154] ss:$8 sps:$4 sm:$0xff]  }
  0x38   :  { %742 = vmatprep.subr.bf16.mxu1 %v1370_v6  ;;  %v1379_v11 = vld [vmem:[#allocation5 + $0x44] ss:$8 sps:$4 sm:$0xff]   ;;  %v1378_v12 = vld [vmem:[#allocation5 + $0x150] ss:$8 sps:$4 sm:$0xff]   ;;  %v1381_v14 = vld [vmem:[#allocation5 + $0x40] ss:$8 sps:$4 sm:$0xff]  }
  0x39   :  { %v1382_v13 = vld [vmem:[#allocation5 + $0x144] ss:$8 sps:$4 sm:$0xff]   ;;  %v1385_v15 = vld [vmem:[#allocation5 + $0x34] ss:$8 sps:$4 sm:$0xff]   ;;  %v1384_v16 = vld [vmem:[#allocation5 + $0x140] ss:$8 sps:$4 sm:$0xff]  }
  0x3a   :  { %702 = vmatpush1.bf16.msra.mxu0 %v1369_v5  ;;  %v1388_v17 = vld [vmem:[#allocation5 + $0x134] ss:$8 sps:$4 sm:$0xff]   ;;  %v1387_v18 = vld [vmem:[#allocation5 + $0x30] ss:$8 sps:$4 sm:$0xff]   ;;  %v1391_v19 = vld [vmem:[#allocation5 + $0x24] ss:$8 sps:$4 sm:$0xff]  }
  0x3b   :  { %703 = vmatprep.subr.bf16.mxu0 %v1373_v8  ;;  %743 = vmatpush1.bf16.msra.mxu1 %v1372_v7  ;;  %v1390_v20 = vld [vmem:[#allocation5 + $0x130] ss:$8 sps:$4 sm:$0xff]   ;;  %v1394_v21 = vld [vmem:[#allocation5 + $0x124] ss:$8 sps:$4 sm:$0xff]   ;;  %v1393_v22 = vld [vmem:[#allocation5 + $0x20] ss:$8 sps:$4 sm:$0xff]  }
  0x3c   :  { %744 = vmatprep.subr.bf16.mxu1 %v1376_v10  ;;  %v1397_v23 = vld [vmem:[#allocation5 + $0x14] ss:$8 sps:$4 sm:$0xff]   ;;  %v1396_v24 = vld [vmem:[#allocation5 + $0x120] ss:$8 sps:$4 sm:$0xff]   ;;  %v1399_v26 = vld [vmem:[#allocation5 + $0x10] ss:$8 sps:$4 sm:$0xff]  }
  0x3d   :  { %v1400_v25 = vld [vmem:[#allocation5 + $0x114] ss:$8 sps:$4 sm:$0xff]   ;;  %v1403_v27 = vld [vmem:[#allocation5 + $0x4] ss:$8 sps:$4 sm:$0xff]   ;;  %v1402_v28 = vld [vmem:[#allocation5 + $0x110] ss:$8 sps:$4 sm:$0xff]  }
  0x3e   :  { %704 = vmatpush1.bf16.msra.mxu0 %v1375_v9  ;;  %v1406_v29 = vld [vmem:[#allocation5 + $0x104] ss:$8 sps:$4 sm:$0xff]   ;;  %v1405_v30 = vld [vmem:[#allocation5] ss:$8 sps:$4 sm:$0xff]   ;;  %v1409_v31 = vld [vmem:[#allocation5 + $0xf4] ss:$8 sps:$4 sm:$0xff]  }
  0x3f   :  { %705 = vmatprep.subr.bf16.mxu0 %v1379_v11  ;;  %745 = vmatpush1.bf16.msra.mxu1 %v1378_v12  ;;  %v1408_v32 = vld [vmem:[#allocation5 + $0x100] ss:$8 sps:$4 sm:$0xff]   ;;  %v1412_v33 = vld [vmem:[#allocation5 + $0x1f4] ss:$8 sps:$4 sm:$0xff]   ;;  %v1411_v34 = vld [vmem:[#allocation5 + $0xf0] ss:$8 sps:$4 sm:$0xff]  }
  0x40   :  { %746 = vmatprep.subr.bf16.mxu1 %v1382_v13  ;;  %v1415_v35 = vld [vmem:[#allocation5 + $0xe4] ss:$8 sps:$4 sm:$0xff]   ;;  %v1414_v36 = vld [vmem:[#allocation5 + $0x1f0] ss:$8 sps:$4 sm:$0xff]   ;;  %v1417_v38 = vld [vmem:[#allocation5 + $0xe0] ss:$8 sps:$4 sm:$0xff]  }
  0x41   :  { %v1418_v37 = vld [vmem:[#allocation5 + $0x1e4] ss:$8 sps:$4 sm:$0xff]   ;;  %v1421_v39 = vld [vmem:[#allocation5 + $0xd4] ss:$8 sps:$4 sm:$0xff]   ;;  %v1420_v40 = vld [vmem:[#allocation5 + $0x1e0] ss:$8 sps:$4 sm:$0xff]  }
  0x42   :  { %706 = vmatpush1.bf16.msra.mxu0 %v1381_v14  ;;  %v1424_v41 = vld [vmem:[#allocation5 + $0x1d4] ss:$8 sps:$4 sm:$0xff]   ;;  %v1423_v42 = vld [vmem:[#allocation5 + $0xd0] ss:$8 sps:$4 sm:$0xff]   ;;  %v1427_v43 = vld [vmem:[#allocation5 + $0xc4] ss:$8 sps:$4 sm:$0xff]  }
  0x43   :  { %707 = vmatprep.subr.bf16.mxu0 %v1385_v15  ;;  %747 = vmatpush1.bf16.msra.mxu1 %v1384_v16  ;;  %v1426_v44 = vld [vmem:[#allocation5 + $0x1d0] ss:$8 sps:$4 sm:$0xff]   ;;  %v1430_v45 = vld [vmem:[#allocation5 + $0x1c4] ss:$8 sps:$4 sm:$0xff]   ;;  %v1429_v47 = vld [vmem:[#allocation5 + $0xc0] ss:$8 sps:$4 sm:$0xff]  }
  0x44   :  { %748 = vmatprep.subr.bf16.mxu1 %v1388_v17  ;;  %v82_v46 = vld [vmem:[#allocation2 + $0x8] sm:$0xff]  ;;  %v84_v50 = vld [vmem:[#allocation2 + $0x18] sm:$0xff]  ;;  %v81_v4 = vld [vmem:[#allocation2] sm:$0xff]  ;;  %vm695_vm0 = vcmask 130048   ;;  %vm1650_vm1 = vmmov 0   ;;  %s1651_s26 = smov [#allocation10]  }
  0x45   :  { %v89_v48 = vpack.c.bf16 %v82_v46, %v82_v46  ;;  %v1433_v49 = vld [vmem:[#allocation5 + $0xb4] ss:$8 sps:$4 sm:$0xff]   ;;  %v1432_v51 = vld [vmem:[#allocation5 + $0x1c0] ss:$8 sps:$4 sm:$0xff]   ;;  %v91_v52 = vpack.c.bf16 %v84_v50, %v84_v50  ;;  %v1435_v54 = vld [vmem:[#allocation5 + $0xb0] ss:$8 sps:$4 sm:$0xff]   ;;  %v88_v7 = vpack.c.bf16 %v81_v4, %v81_v4 }
  0x46   :  { %708 = vmatpush1.bf16.msra.mxu0 %v1387_v18  ;;  %v1436_v53 = vld [vmem:[#allocation5 + $0x1b4] ss:$8 sps:$4 sm:$0xff]   ;;  %v1439_v55 = vld [vmem:[#allocation5 + $0xa4] ss:$8 sps:$4 sm:$0xff]   ;;  %v1438_v56 = vld [vmem:[#allocation5 + $0x1b0] ss:$8 sps:$4 sm:$0xff]  }
  0x47   :  { %709 = vmatprep.subr.bf16.mxu0 %v1391_v19  ;;  %749 = vmatpush1.bf16.msra.mxu1 %v1390_v20  ;;  %v1442_v57 = vld [vmem:[#allocation5 + $0x1a4] ss:$8 sps:$4 sm:$0xff]   ;;  %v1441_v58 = vld [vmem:[#allocation5 + $0xa0] ss:$8 sps:$4 sm:$0xff]   ;;  %v1445_v59 = vld [vmem:[#allocation5 + $0x94] ss:$8 sps:$4 sm:$0xff]  }
  0x48   :  { %750 = vmatprep.subr.bf16.mxu1 %v1394_v21  ;;  %731 = vmatprep.mubr.bf16.mxu0 %v89_v48  ;;  %v1444_v60 = vld [vmem:[#allocation5 + $0x1a0] ss:$8 sps:$4 sm:$0xff]   ;;  %v1448_v61 = vld [vmem:[#allocation5 + $0x194] ss:$8 sps:$4 sm:$0xff]   ;;  %v1447_v62 = vld [vmem:[#allocation5 + $0x90] ss:$8 sps:$4 sm:$0xff]  }
  0x49   :  { %772 = vmatprep.mubr.bf16.mxu1 %v91_v52  ;;  %v1451_v63 = vld [vmem:[#allocation5 + $0x84] ss:$8 sps:$4 sm:$0xff]   ;;  %v1450_v0 = vld [vmem:[#allocation5 + $0x190] ss:$8 sps:$4 sm:$0xff]   ;;  %v1453_v1 = vld [vmem:[#allocation5 + $0x80] ss:$8 sps:$4 sm:$0xff]  }
  0x4a   :  { %710 = vmatpush1.bf16.msra.mxu0 %v1393_v22  ;;  %v1454_v2 = vld [vmem:[#allocation5 + $0x184] ss:$8 sps:$4 sm:$0xff]   ;;  %v1456_v3 = vld [vmem:[#allocation5 + $0x180] ss:$8 sps:$4 sm:$0xff]   ;;  %v1459_v5 = vld [vmem:[#allocation5 + $0x274] ss:$8 sps:$4 sm:$0xff]  }
  0x4b   :  { %711 = vmatprep.subr.bf16.mxu0 %v1397_v23  ;;  %751 = vmatpush1.bf16.msra.mxu1 %v1396_v24  ;;  %v83_v6 = vld [vmem:[#allocation2 + $0x10] sm:$0xff]  ;;  %v1462_v9 = vld [vmem:[#allocation5 + $0x264] ss:$8 sps:$4 sm:$0xff]   ;;  %v1502_v11 = vld [vmem:[#allocation5 + $0x300] ss:$8 sps:$4 sm:$0xff]   ;;  %v1648_v19 = vmov 0  }
  0x4c   :  { %752 = vmatprep.subr.bf16.mxu1 %v1400_v25  ;;  %v1457_v8 = vld [vmem:[#allocation5 + $0x270] ss:$8 sps:$4 sm:$0xff]   ;;  %v90_v10 = vpack.c.bf16 %v83_v6, %v83_v6  ;;  %v1504_v12 = vld [vmem:[#allocation5 + $0x304] ss:$8 sps:$4 sm:$0xff]   ;;  %v1460_v13 = vld [vmem:[#allocation5 + $0x260] ss:$8 sps:$4 sm:$0xff]  }
  0x4d   :  { %v1465_v14 = vld [vmem:[#allocation5 + $0x254] ss:$8 sps:$4 sm:$0xff]   ;;  %v1463_v18 = vld [vmem:[#allocation5 + $0x250] ss:$8 sps:$4 sm:$0xff]   ;;  %v1468_v20 = vld [vmem:[#allocation5 + $0x244] ss:$8 sps:$4 sm:$0xff]  }
  0x4e   :  { %712 = vmatpush1.bf16.msra.mxu0 %v1399_v26  ;;  %v87_v15 = vld [vmem:[#allocation2 + $0x30] sm:$0xff]  ;;  %v86_v16 = vld [vmem:[#allocation2 + $0x28] sm:$0xff]  ;;  %v1466_v22 = vld [vmem:[#allocation5 + $0x240] ss:$8 sps:$4 sm:$0xff]   ;;  %s1162_s27 = sshll.u32 %s1651_s26, 4  ;;  %s1163_s27 = int_to_ptr.vmem [resolvable:$true] %s1162_s27 }
  0x4f   :  { %713 = vmatprep.subr.bf16.mxu0 %v1403_v27  ;;  %753 = vmatpush1.bf16.msra.mxu1 %v1402_v28  ;;  %v93_v17 = vpack.c.bf16 %v86_v16, %v86_v16  ;;  %v94_v21 = vpack.c.bf16 %v87_v15, %v87_v15  ;;  %v1471_v23 = vld [vmem:[#allocation5 + $0x234] ss:$8 sps:$4 sm:$0xff]   ;;  %v1469_v24 = vld [vmem:[#allocation5 + $0x230] ss:$8 sps:$4 sm:$0xff]   ;;  %v1474_v25 = vld [vmem:[#allocation5 + $0x224] ss:$8 sps:$4 sm:$0xff]   ;;  %p1617_p7 = scmp.lt.s32.totalorder %s1163_s27, %s1163_s27 }
  0x50   :  { %754 = vmatprep.subr.bf16.mxu1 %v1406_v29  ;;  %v1472_v26 = vld [vmem:[#allocation5 + $0x220] ss:$8 sps:$4 sm:$0xff]   ;;  %v1477_v27 = vld [vmem:[#allocation5 + $0x214] ss:$8 sps:$4 sm:$0xff]   ;;  %v1475_v28 = vld [vmem:[#allocation5 + $0x210] ss:$8 sps:$4 sm:$0xff]  }
  0x51   :  { %v1480_v29 = vld [vmem:[#allocation5 + $0x204] ss:$8 sps:$4 sm:$0xff]   ;;  %v1505_v46 = vld [vmem:[#allocation5 + $0x280] ss:$8 sps:$4 sm:$0xff]  }
  0x52   :  { %714 = vmatpush1.bf16.msra.mxu0 %v1405_v30  ;;  %v1478_v30 = vld [vmem:[#allocation5 + $0x200] ss:$8 sps:$4 sm:$0xff]  }
  0x53   :  { %715 = vmatprep.subr.bf16.mxu0 %v1409_v31  ;;  %755 = vmatpush1.bf16.msra.mxu1 %v1408_v32  ;;  %v1483_v31 = vld [vmem:[#allocation5 + $0x2f4] ss:$8 sps:$4 sm:$0xff]   ;;  %v1481_v32 = vld [vmem:[#allocation5 + $0x2f0] ss:$8 sps:$4 sm:$0xff]   ;;  %v1509_v50 = vld [vmem:[#allocation7 + $0x38] sm:$0xff]  }
  0x54   :  { %756 = vmatprep.subr.bf16.mxu1 %v1412_v33  ;;  %v1486_v33 = vld [vmem:[#allocation5 + $0x2e4] ss:$8 sps:$4 sm:$0xff]  }
  0x55   :  { %v1511_v52 = vld [vmem:[#allocation7 + $0x30] sm:$0xff]  }
  0x56   :  { %716 = vmatpush2.bf16.msra.mxu0 %v1411_v34  ;;  %v1484_v34 = vld [vmem:[#allocation5 + $0x2e0] ss:$8 sps:$4 sm:$0xff]  }
  0x57   :  { %717 = vmatprep.subr.bf16.mxu0 %v1415_v35  ;;  %757 = vmatpush2.bf16.msra.mxu1 %v1414_v36  ;;  %v1489_v35 = vld [vmem:[#allocation5 + $0x2d4] ss:$8 sps:$4 sm:$0xff]   ;;  %v1487_v36 = vld [vmem:[#allocation5 + $0x2d0] ss:$8 sps:$4 sm:$0xff]  }
  0x58   :  { %758 = vmatprep.subr.bf16.mxu1 %v1418_v37  ;;  %v1492_v37 = vld [vmem:[#allocation5 + $0x2c4] ss:$8 sps:$4 sm:$0xff]  }
  0x5a   :  { %718 = vmatpush2.bf16.msra.mxu0 %v1417_v38  ;;  %v1490_v38 = vld [vmem:[#allocation5 + $0x2c0] ss:$8 sps:$4 sm:$0xff]  }
  0x5b   :  { %719 = vmatprep.subr.bf16.mxu0 %v1421_v39  ;;  %759 = vmatpush2.bf16.msra.mxu1 %v1420_v40  ;;  %v1495_v39 = vld [vmem:[#allocation5 + $0x2b4] ss:$8 sps:$4 sm:$0xff]   ;;  %v1493_v40 = vld [vmem:[#allocation5 + $0x2b0] ss:$8 sps:$4 sm:$0xff]  }
  0x5c   :  { %760 = vmatprep.subr.bf16.mxu1 %v1424_v41  ;;  %v1498_v41 = vld [vmem:[#allocation5 + $0x2a4] ss:$8 sps:$4 sm:$0xff]  }
  0x5e   :  { %720 = vmatpush2.bf16.msra.mxu0 %v1423_v42  ;;  %v1496_v42 = vld [vmem:[#allocation5 + $0x2a0] ss:$8 sps:$4 sm:$0xff]  }
  0x5f   :  { %721 = vmatprep.subr.bf16.mxu0 %v1427_v43  ;;  %761 = vmatpush2.bf16.msra.mxu1 %v1426_v44  ;;  %v1501_v43 = vld [vmem:[#allocation5 + $0x294] ss:$8 sps:$4 sm:$0xff]   ;;  %v1499_v44 = vld [vmem:[#allocation5 + $0x290] ss:$8 sps:$4 sm:$0xff]  }
  0x60   :  { %762 = vmatprep.subr.bf16.mxu1 %v1430_v45  ;;  %v1507_v45 = vld [vmem:[#allocation5 + $0x284] ss:$8 sps:$4 sm:$0xff]  }
  0x62   :  { %722 = vmatpush2.bf16.msra.mxu0 %v1429_v47  ;;  %v85_v47 = vld [vmem:[#allocation2 + $0x20] sm:$0xff] }
  0x63   :  { %723 = vmatprep.subr.bf16.mxu0 %v1433_v49  ;;  %763 = vmatpush2.bf16.msra.mxu1 %v1432_v51  ;;  %v92_v48 = vpack.c.bf16 %v85_v47, %v85_v47  ;;  %v1508_v49 = vld [vmem:[#allocation7 + $0x78] sm:$0xff]   ;;  %v1510_v51 = vld [vmem:[#allocation7 + $0x70] sm:$0xff]  }
  0x64   :  { %764 = vmatprep.subr.bf16.mxu1 %v1436_v53  ;;  %v1512_v53 = vld [vmem:[#allocation7 + $0x68] sm:$0xff]  }
  0x66   :  { %724 = vmatpush2.bf16.msra.mxu0 %v1435_v54  ;;  %v1513_v54 = vld [vmem:[#allocation7 + $0x28] sm:$0xff]  }
  0x67   :  { %725 = vmatprep.subr.bf16.mxu0 %v1439_v55  ;;  %765 = vmatpush2.bf16.msra.mxu1 %v1438_v56  ;;  %v1514_v55 = vld [vmem:[#allocation7 + $0x60] sm:$0xff]  }
  0x68   :  { %766 = vmatprep.subr.bf16.mxu1 %v1442_v57  ;;  %v1515_v56 = vld [vmem:[#allocation7 + $0x20] sm:$0xff]   ;;  %v1516_v57 = vld [vmem:[#allocation7 + $0x58] sm:$0xff]  }
  0x6a   :  { %726 = vmatpush2.bf16.msra.mxu0 %v1441_v58  ;;  %v1517_v58 = vld [vmem:[#allocation7 + $0x18] sm:$0xff]  }
  0x6b   :  { %727 = vmatprep.subr.bf16.mxu0 %v1445_v59  ;;  %767 = vmatpush2.bf16.msra.mxu1 %v1444_v60  ;;  %v1518_v59 = vld [vmem:[#allocation7 + $0x50] sm:$0xff]  }
  0x6c   :  { %768 = vmatprep.subr.bf16.mxu1 %v1448_v61  ;;  %v1519_v60 = vld [vmem:[#allocation7 + $0x10] sm:$0xff]   ;;  %v1520_v61 = vld [vmem:[#allocation7 + $0x48] sm:$0xff]  }
  0x6e   :  { %728 = vmatpush2.bf16.msra.mxu0 %v1447_v62  ;;  %v1521_v62 = vld [vmem:[#allocation7 + $0x8] sm:$0xff]  }
  0x6f   :  { %729 = vmatprep.subr.bf16.mxu0 %v1451_v63  ;;  %769 = vmatpush2.bf16.msra.mxu1 %v1450_v0  ;;  %v1522_v63 = vld [vmem:[#allocation7 + $0x40] sm:$0xff]  }
  0x70   :  { %770 = vmatprep.subr.bf16.mxu1 %v1454_v2  ;;  %v1523_v0 = vld [vmem:[#allocation7] sm:$0xff]  }
  0x72   :  { %730 = vmatpush2.bf16.msra.mxu0 %v1453_v1  ;;  %v1649_v1 = vmov 0.0  }
  0x73   :  { %781 = vmatprep.subr.bf16.mxu0 %v1459_v5  ;;  %771 = vmatpush2.bf16.msra.mxu1 %v1456_v3 }
  0x74   :  { %836 = vmatprep.subr.bf16.mxu1 %v1504_v12 }
  0x75   :  { %732 = vmatmul.mubr.bf16.vlgmr.msra.gmra.mxu0 %v88_v7 }
  0x76   :  { %782 = vmatpush1.bf16.msra.mxu0 %v1457_v8  ;;  %773 = vmatmul.mubr.bf16.vlgmr.msra.gmra.mxu1 %v90_v10 }
  0x77   :  { %783 = vmatprep.subr.bf16.mxu0 %v1462_v9  ;;  %837 = vmatpush1.bf16.msra.mxu1 %v1502_v11 }
  0x78   :  { %854 = vmatprep.mubr.bf16.mxu1 %v1648_v19  ;;  %813 = vmatprep.mubr.bf16.mxu0 %v93_v17  ;;  %v193_v17 = vld [vmem:[%s1728_s2] sm:$0x3] }
  0x79   :  { %1298 = vmatprep.subr.bf16.mxu1 %v1508_v49 }
  0x7a   :  { %784 = vmatpush1.bf16.msra.mxu0 %v1460_v13 }
  0x7b   :  { %785 = vmatprep.subr.bf16.mxu0 %v1465_v14  ;;  %v195_v14 = vlaneseq }
  0x7d   :  { %v196_v15 = vshrl.u32 %v195_v14, 7 }
  0x7e   :  { %786 = vmatpush1.bf16.msra.mxu0 %v1463_v18  ;;  %1271 = vmatmul.mubr.msk.bf16.vlgmr.msra.gmra.mxu1 %vm695_vm0, %v94_v21 }
  0x7f   :  { %787 = vmatprep.subr.bf16.mxu0 %v1468_v20  ;;  %1299 = vmatpush3.bf16.msra.mxu1 %v1509_v50  ;;  %v197_v16 = vsub.s32 0, %v196_v15  ;;  %v201_v18 = vsub.s32 1, %v196_v15 }
  0x80   :  { %1300 = vmatprep.subr.bf16.mxu1 %v1510_v51 }
  0x81   :  { %v198_v19 = vrot.slane %v193_v17, %v197_v16  ;;  %v202_v20 = vrot.slane %v193_v17, %v201_v18 }
  0x82   :  { %788 = vmatpush1.bf16.msra.mxu0 %v1466_v22 }
  0x83   :  { %789 = vmatprep.subr.bf16.mxu0 %v1471_v23  ;;  %1301 = vmatpush3.bf16.msra.mxu1 %v1511_v52 }
  0x84   :  { %1302 = vmatprep.subr.bf16.mxu1 %v1512_v53 }
  0x86   :  { %790 = vmatpush1.bf16.msra.mxu0 %v1469_v24 }
  0x87   :  { %791 = vmatprep.subr.bf16.mxu0 %v1474_v25  ;;  %1303 = vmatpush3.bf16.msra.mxu1 %v1513_v54  ;;  %v1289_v54 = vld [vmem:[%s1732_s6] ss:$0 sm:$0xff] }
  0x88   :  { %1304 = vmatprep.subr.bf16.mxu1 %v1514_v55 }
  0x8a   :  { %792 = vmatpush1.bf16.msra.mxu0 %v1472_v26 }
  0x8b   :  { %793 = vmatprep.subr.bf16.mxu0 %v1477_v27  ;;  %1305 = vmatpush3.bf16.msra.mxu1 %v1515_v56 }
  0x8c   :  { %1306 = vmatprep.subr.bf16.mxu1 %v1516_v57 }
  0x8e   :  { %794 = vmatpush1.bf16.msra.mxu0 %v1475_v28 }
  0x8f   :  { %795 = vmatprep.subr.bf16.mxu0 %v1480_v29  ;;  %1307 = vmatpush3.bf16.msra.mxu1 %v1517_v58 }
  0x90   :  { %1308 = vmatprep.subr.bf16.mxu1 %v1518_v59 }
  0x92   :  { %796 = vmatpush1.bf16.msra.mxu0 %v1478_v30 }
  0x93   :  { %797 = vmatprep.subr.bf16.mxu0 %v1483_v31  ;;  %1309 = vmatpush3.bf16.msra.mxu1 %v1519_v60 }
  0x94   :  { %1310 = vmatprep.subr.bf16.mxu1 %v1520_v61 }
  0x96   :  { %798 = vmatpush2.bf16.msra.mxu0 %v1481_v32 }
  0x97   :  { %799 = vmatprep.subr.bf16.mxu0 %v1486_v33  ;;  %1311 = vmatpush3.bf16.msra.mxu1 %v1521_v62 }
  0x98   :  { %1312 = vmatprep.subr.bf16.mxu1 %v1522_v63 }
  0x9a   :  { %800 = vmatpush2.bf16.msra.mxu0 %v1484_v34 }
  0x9b   :  { %801 = vmatprep.subr.bf16.mxu0 %v1489_v35  ;;  %1313 = vmatpush3.bf16.msra.mxu1 %v1523_v0 }
  0x9c   :  { %1329 = vmatprep.subr.bf16.mxu1 %v1649_v1 }
  0x9e   :  { %802 = vmatpush2.bf16.msra.mxu0 %v1487_v36  ;;  %v1524_v36 = vld [vmem:[#allocation8 + $0x38] sm:$0xff]  }
  0x9f   :  { %803 = vmatprep.subr.bf16.mxu0 %v1492_v37 }
  0xa2   :  { %804 = vmatpush2.bf16.msra.mxu0 %v1490_v38  ;;  %v1525_v38 = vld [vmem:[#allocation8 + $0x30] sm:$0xff]  }
  0xa3   :  { %805 = vmatprep.subr.bf16.mxu0 %v1495_v39  ;;  %v1526_v39 = vld [vmem:[#allocation8 + $0x28] sm:$0xff]  }
  0xa6   :  { %806 = vmatpush2.bf16.msra.mxu0 %v1493_v40  ;;  %v1527_v40 = vld [vmem:[#allocation8 + $0x20] sm:$0xff]  }
  0xa7   :  { %807 = vmatprep.subr.bf16.mxu0 %v1498_v41  ;;  %v1528_v41 = vld [vmem:[#allocation8 + $0x18] sm:$0xff]  }
  0xaa   :  { %808 = vmatpush2.bf16.msra.mxu0 %v1496_v42  ;;  %v1529_v42 = vld [vmem:[#allocation8 + $0x10] sm:$0xff]  }
  0xab   :  { %809 = vmatprep.subr.bf16.mxu0 %v1501_v43  ;;  %v1530_v43 = vld [vmem:[#allocation8 + $0x8] sm:$0xff]  }
  0xae   :  { %810 = vmatpush2.bf16.msra.mxu0 %v1499_v44  ;;  %v1531_v44 = vld [vmem:[#allocation8] sm:$0xff]  }
  0xaf   :  { %811 = vmatprep.subr.bf16.mxu0 %v1507_v45 }
  0xb2   :  { %812 = vmatpush2.bf16.msra.mxu0 %v1505_v46  ;;  %v1272_v46 = vld [vmem:[%s1730_s4] ss:$0 sm:$0xff]  ;;  %s1612_s4 = scalar_lea.vmem %s1163_s27, 128 }
  0xb3   :  { %p1613_p6 = scmp.ne.s32.totalorder %s1163_s27, %s1612_s4  ;;  %p1618_p8 = scmp.lt.s32.totalorder %s1612_s4, %s1612_s4 }
  0xb5   :  { %814 = vmatmul.mubr.bf16.vlgmr.msra.gmra.mxu0 %v92_v48  ;;  %p1619_p9 = por %p1618_p8, %p1617_p7 }
  0xb7   :  { %p1620_p10 = pnand %p1619_p9, %p1613_p6 }
 0x135   :  { %v733_v2 = vpop.f32.mrf.mxu0 }
 0x136   :  { %v774_v4 = vpop.f32.mrf.mxu1  ;;  %v734_v21 = vadd.f32 %v733_v2, %v198_v19 }
 0x137   :  { %v735_v3 = vpop.f32.mrf.mxu0 }
 0x138   :  { %v776_v6 = vpop.f32.mrf.mxu1  ;;  %v736_v22 = vadd.f32 %v735_v3, %v202_v20  ;;  %v775_v23 = vadd.f32 %v774_v4, %v734_v21 }
 0x139   :  { %v737_v5 = vpop.f32.mrf.mxu0 }
 0x13a   :  { %v778_v8 = vpop.f32.mrf.mxu1  ;;  %v777_v25 = vadd.f32 %v776_v6, %v736_v22 }
 0x13b   :  { %v738_v7 = vpop.f32.mrf.mxu0 }
 0x13c   :  { %v779_v9 = vpop.f32.mrf.mxu1 }
 0x13e   :  { %v856_v10 = vpop.f32.mrf.mxu1 }
 0x140   :  { %v858_v11 = vpop.f32.mrf.mxu1 }
 0x142   :  { %v860_v12 = vpop.f32.mrf.mxu1 }
 0x144   :  { %v861_v13 = vpop.f32.mrf.mxu1 }
 0x175   :  { %v815_v24 = vpop.f32.mrf.mxu0 }
 0x176   :  { %v816_v26 = vadd.f32 %v815_v24, %v775_v23 }
 0x177   :  { %v817_v27 = vpop.f32.mrf.mxu0 }
 0x178   :  { %v857_v28 = vadd.f32 %v856_v10, %v816_v26  ;;  %v818_v29 = vadd.f32 %v817_v27, %v777_v25 }
 0x179   :  { %v819_v30 = vpop.f32.mrf.mxu0 }
 0x17a   :  { %v859_v31 = vadd.f32 %v858_v11, %v818_v29  ;;  %v863_v32 = vmax.f32 %v857_v28, 0.0 }
 0x17b   :  { %v820_v33 = vpop.f32.mrf.mxu0 }
 0x17c   :  { %v864_v34 = vmax.f32 %v859_v31, 0.0  ;;  %v865_v37 = vpack.c.bf16 %v863_v32, %v863_v32 }
 0x17e   :  { %v866_v35 = vpack.c.bf16 %v864_v34, %v864_v34 }
 0x180   :  { %1034 = vmatprep.mubr.bf16.mxu1 %v866_v35 }
 0x181   :  { %1035 = vmatmul.mubr.bf16.vlgmr.msra.gmra.mxu1 %v865_v37 }
 0x182   :  { %1330 = vmatpush3.bf16.msra.mxu1 %v1524_v36  ;;  %1345 = vmatprep.mubr.msk.bf16.mxu1 %vm1650_vm1, %v1649_v1 }
 0x183   :  { %1331 = vmatprep.subr.bf16.mxu1 %v1649_v1 }
 0x186   :  { %1332 = vmatpush3.bf16.msra.mxu1 %v1525_v38 }
 0x187   :  { %1333 = vmatprep.subr.bf16.mxu1 %v1649_v1 }
 0x18a   :  { %1334 = vmatpush3.bf16.msra.mxu1 %v1526_v39 }
 0x18b   :  { %1335 = vmatprep.subr.bf16.mxu1 %v1649_v1 }
 0x18e   :  { %1336 = vmatpush3.bf16.msra.mxu1 %v1527_v40 }
 0x18f   :  { %1337 = vmatprep.subr.bf16.mxu1 %v1649_v1 }
 0x192   :  { %1338 = vmatpush3.bf16.msra.mxu1 %v1528_v41 }
 0x193   :  { %1339 = vmatprep.subr.bf16.mxu1 %v1649_v1 }
 0x196   :  { %1340 = vmatpush3.bf16.msra.mxu1 %v1529_v42 }
 0x197   :  { %1341 = vmatprep.subr.bf16.mxu1 %v1649_v1 }
 0x19a   :  { %1342 = vmatpush3.bf16.msra.mxu1 %v1530_v43 }
 0x19b   :  { %1343 = vmatprep.subr.bf16.mxu1 %v1649_v1 }
 0x19e   :  { %1344 = vmatpush3.bf16.msra.mxu1 %v1531_v44 }
 0x241   :  { %v1314_v45 = vpop.f32.mrf.mxu1 }
 0x243   :  { %v1315_v47 = vpop.f32.mrf.mxu1 }
 0x244   :  { %v1316_v48 = vadd.f32 %v1315_v47, %v1314_v45 }
 0x245   :  { %v1317_v49 = vpop.f32.mrf.mxu1 }
 0x246   :  { %v1037_v50 = vadd.f32 %v1316_v48, %v1272_v46 }
 0x247   :  { %v1318_v51 = vpop.f32.mrf.mxu1 }
 0x248   :  { %v1042_v52 = vmax.f32 %v1037_v50, 0.0 }
 0x24a   :  { %v1043_v53 = vpack.c.bf16 %v1042_v52, %v1042_v52 }
 0x24c   :  { %1346 = vmatmul.mubr.bf16.vlgmr.msra.gmra.mxu1 %v1043_v53 }
 0x30c   :  { %v1149_v55 = vpop.f32.mrf.mxu1 }
 0x30d   :  { %v1150_v56 = vadd.f32 %v1289_v54, %v1149_v55 }
 0x30e   :  { %v1347_v57 = vpop.f32.mrf.mxu1 }
 0x30f   :  { %1155 = vst [vmem:[#allocation10] sm:$0xff] %v1150_v56 }
 0x310   :  { %v1152_v58 = vpop.f32.mrf.mxu1 }
 0x311   :  { %1623 = shalt.err (!%p1620_p10)
}
 0x312   :  { %1165 = dma.vmem_to_hbm [thread:$0]  %s1163_s27, 128, %s1733_s7, [#allocation4]   ;;  %v1348_v59 = vpop.f32.mrf.mxu1 }
 0x313   :  { %1638 = dma.done.wait [#allocation4], 128  }
 0x314   :  { %1639 = vsyncadd [#allocation4], 4294967168 }
 0x315   :  { %1169 = vsyncpa [#allocation3], 1 }
 0x316   :  { %1170 = vsyncpa [#allocation6], 1 }
 0x317   :  { %1171 = vsyncpa [#allocation9], 1 }
 0x318   :  { %1172 = vsyncpa [#allocation4], 1 }

</bundles_post_ra>
